<compile_context>
chip_gen: v5e
topology: v5e:2x2
jax: 0.10.0
libtpu: 0.0.40
codegen_flags: <defaults>
</compile_context>

<pallas_src>
import jax
import jax.numpy as jnp
from jax import lax
from jax.experimental import pallas as pl
from jax.experimental.pallas import tpu as pltpu


# --------------------------------------------------------------------------
# Pallas kernel
# --------------------------------------------------------------------------
def _bilstm_kernel(x_ref, w_in_ref, w_hh_ref, b_ref, out_ref, xg):
    """Interleaved bidirectional LSTM (batch = 1) over a [T, 2E] input.

    x_ref   : [T, 2E]  — emb[t] in cols [0:E], emb[T-1-t] in cols [E:2E]
    w_in_ref: [2E, 8H] — fused, gate-major input projection (both directions)
    w_hh_ref: [2H, 8H] — block-diagonal recurrent projection over [h_f | h_b]
    b_ref   : [1, 8H]  — fused (b_ih + b_hh) for both directions
    out_ref : [T, 2H]  — fwd hidden in lanes [0:H], bwd in lanes [H:2H]
    xg      : [T, 8H]  — VMEM scratch for precomputed input-gate slab
    """
    T = x_ref.shape[0]
    H2 = w_hh_ref.shape[0]          # 2 * hidden
    H = H2 // 2

    # Single fused input-projection MXU pass for both directions.
    # xg[t] = [gates from emb[t] (fwd) | gates from emb[T-1-t] (bwd)],
    # gate-major: [i_f i_b | f_f f_b | g_f g_b | o_f o_b].
    xg[...] = jnp.dot(x_ref[...], w_in_ref[...],
                      preferred_element_type=jnp.float32) + b_ref[...]

    w_hh = w_hh_ref[...]            # [2H, 8H], hoisted out of the loop

    def step(t, carry):
        h, c = carry                # [1, 2H] each — live in vregs
        # One recurrent MXU matmul feeds both directions' gates.
        gates = xg[pl.ds(t, 1), :] + jnp.dot(
            h, w_hh, preferred_element_type=jnp.float32)      # [1, 8H]
        sig = jax.nn.sigmoid(gates)                            # full-width EUP
        tg = jnp.tanh(gates)
        i = sig[:, 0 * H2:1 * H2]
        f = sig[:, 1 * H2:2 * H2]
        g = tg[:, 2 * H2:3 * H2]
        o = sig[:, 3 * H2:4 * H2]
        c_new = f * c + i * g                                  # [1, 2H]
        h_new = o * jnp.tanh(c_new)                            # [1, 2H]
        # fwd half -> output row t; bwd half -> output row T-1-t
        # (source and destination lane positions already coincide).
        out_ref[pl.ds(t, 1), 0:H] = h_new[:, 0:H]
        out_ref[pl.ds(T - 1 - t, 1), H:H2] = h_new[:, H:H2]
        return h_new, c_new

    zeros = jnp.zeros((1, H2), jnp.float32)
    lax.fori_loop(0, T, step, (zeros, zeros), unroll=True)


# --------------------------------------------------------------------------
# Weight packing (plain JAX glue)
# --------------------------------------------------------------------------
def _gate_major(wf, wb, H):
    """[R,4H],[R,4H] -> [R,8H] with per-gate blocks [gate_fwd | gate_bwd]."""
    R = wf.shape[0]
    return jnp.stack([wf.reshape(R, 4, H), wb.reshape(R, 4, H)],
                     axis=2).reshape(R, 8 * H)


def _pack_bidir(params):
    """Pack per-direction LSTM weights into the fused kernel layout."""
    H = params["whh_f"].shape[0]
    zi = jnp.zeros_like(params["wih_f"])
    zh = jnp.zeros_like(params["whh_f"])
    # Input projection: rows [0:E] consume emb (feed fwd gate columns),
    # rows [E:2E] consume the time-reversed emb (feed bwd gate columns).
    w_in = jnp.concatenate([_gate_major(params["wih_f"], zi, H),
                            _gate_major(zi, params["wih_b"], H)], axis=0)
    # Recurrent projection: block-diagonal over the fused [h_f | h_b] state.
    w_hh = jnp.concatenate([_gate_major(params["whh_f"], zh, H),
                            _gate_major(zh, params["whh_b"], H)], axis=0)
    b = _gate_major(params["b_f"], params["b_b"], H)
    return w_in, w_hh, b


# --------------------------------------------------------------------------
# Wrapper
# --------------------------------------------------------------------------
@jax.jit
def encoder_forward(sentence, params):
    # Embedding lookup (gather) + weight packing are glue — plain JAX.
    emb = params["embedding"][sentence]                  # [T, E]
    T = emb.shape[0]
    H = params["whh_f"].shape[0]
    x_cat = jnp.concatenate([emb, emb[::-1]], axis=1)    # [T, 2E]
    w_in, w_hh, b = _pack_bidir(params)

    vmem = pl.BlockSpec(memory_space=pltpu.MemorySpace.VMEM)
    out = pl.pallas_call(
        _bilstm_kernel,
        out_shape=jax.ShapeDtypeStruct((T, 2 * H), jnp.float32),
        in_specs=[vmem] * 4,
        out_specs=vmem,
        scratch_shapes=[pltpu.VMEM((T, 8 * H), jnp.float32)],
    )(x_cat, w_in, w_hh, b)

    # lstm_out: (seq_len, batch=1, 2*hidden_dim), fwd half then bwd half —
    # matches PyTorch nn.LSTM(bidirectional=True) with batch=1, zero init.
    return out[:, None, :]


# --------------------------------------------------------------------------
# Parameter init (PyTorch-equivalent shapes) and pure-JAX reference
# --------------------------------------------------------------------------
def init_params(key, vocab_size, embedding_dim, hidden_dim):
    E, H = embedding_dim, hidden_dim
    ks = jax.random.split(key, 9)
    bound = 1.0 / float(jnp.sqrt(jnp.float32(H)))

    def u(k, shape):
        return jax.random.uniform(k, shape, jnp.float32, -bound, bound)

    emb = jax.random.normal(ks[0], (vocab_size, E), jnp.float32)
    # PyTorch stores weight_ih as (4H, E) and weight_hh as (4H, H); keep the
    # transposed layout so x @ W_ih^T and h @ W_hh^T are plain matmuls.
    wih_f = u(ks[1], (4 * H, E)).T
    whh_f = u(ks[2], (4 * H, H)).T
    b_f = (u(ks[3], (4 * H,)) + u(ks[4], (4 * H,)))[None, :]   # b_ih + b_hh
    wih_b = u(ks[5], (4 * H, E)).T
    whh_b = u(ks[6], (4 * H, H)).T
    b_b = (u(ks[7], (4 * H,)) + u(ks[8], (4 * H,)))[None, :]
    return dict(embedding=emb,
                wih_f=wih_f, whh_f=whh_f, b_f=b_f,
                wih_b=wih_b, whh_b=whh_b, b_b=b_b)


def _lstm_ref_dir(embeds, wih, whh, b, reverse):
    H = whh.shape[0]
    xs = embeds[::-1] if reverse else embeds

    def step(carry, x):
        h, c = carry
        gates = x @ wih + h @ whh + b[0]
        i = jax.nn.sigmoid(gates[0 * H:1 * H])
        f = jax.nn.sigmoid(gates[1 * H:2 * H])
        g = jnp.tanh(gates[2 * H:3 * H])
        o = jax.nn.sigmoid(gates[3 * H:4 * H])
        c = f * c + i * g
        h = o * jnp.tanh(c)
        return (h, c), h

    (_, _), hs = lax.scan(step, (jnp.zeros(H), jnp.zeros(H)), xs)
    return hs[::-1] if reverse else hs


def encoder_ref(sentence, params):
    embeds = params["embedding"][sentence]
    h_f = _lstm_ref_dir(embeds, params["wih_f"], params["whh_f"],
                        params["b_f"], reverse=False)
    h_b = _lstm_ref_dir(embeds, params["wih_b"], params["whh_b"],
                        params["b_b"], reverse=True)
    return jnp.concatenate([h_f, h_b], axis=-1)[:, None, :]


if __name__ == "__main__":
    # Small shapes consistent with the module: seq=8, embedding=32, hidden=32.
    vocab_size, embedding_dim, hidden_dim, seq_len = 50, 32, 32, 8

    key = jax.random.PRNGKey(0)
    pkey, skey = jax.random.split(key)
    params = init_params(pkey, vocab_size, embedding_dim, hidden_dim)
    sentence = jax.random.randint(skey, (seq_len,), 0, vocab_size, jnp.int32)

    lstm_out = encoder_forward(sentence, params)
    jax.block_until_ready(lstm_out)

    assert lstm_out.shape == (seq_len, 1, 2 * hidden_dim), lstm_out.shape

    ref_out = encoder_ref(sentence, params)
    assert jnp.allclose(lstm_out, ref_out, atol=1e-4, rtol=1e-4), (
        float(jnp.max(jnp.abs(lstm_out - ref_out))))

    print("KERNEL_OK")
</pallas_src>

<mosaic_0001>
module attributes {stable_mosaic.version = 11 : i64} {
  func.func @_bilstm_kernel(%arg0: memref<8x64xf32, #tpu.memory_space<vmem>>, %arg1: memref<64x256xf32, #tpu.memory_space<vmem>>, %arg2: memref<64x256xf32, #tpu.memory_space<vmem>>, %arg3: memref<1x256xf32, #tpu.memory_space<vmem>>, %arg4: memref<8x64xf32, #tpu.memory_space<vmem>>, %arg5: memref<8x256xf32, #tpu.memory_space<vmem>>) attributes {dimension_semantics = [], scalar_prefetch = 0 : i64, scratch_operands = 1 : i64, tpu.core_type = #tpu.core_type<tc>} {
    %c0 = arith.constant 0 : index
    %c0_0 = arith.constant 0 : index
    %0 = vector.load %arg0[%c0, %c0_0] : memref<8x64xf32, #tpu.memory_space<vmem>>, vector<8x64xf32>
    %c0_1 = arith.constant 0 : index
    %c0_2 = arith.constant 0 : index
    %1 = vector.load %arg1[%c0_1, %c0_2] : memref<64x256xf32, #tpu.memory_space<vmem>>, vector<64x256xf32>
    %cst = arith.constant dense<0.000000e+00> : vector<8x256xf32>
    %2 = tpu.matmul %0, %1, %cst {dimension_numbers = #tpu.dot_dimension_numbers<[1], [0], [0], [1], [0, 0, 1, 1], [], []>} : vector<8x64xf32>, vector<64x256xf32>, vector<8x256xf32> -> vector<8x256xf32>
    %c0_3 = arith.constant 0 : index
    %c0_4 = arith.constant 0 : index
    %3 = vector.load %arg3[%c0_3, %c0_4] : memref<1x256xf32, #tpu.memory_space<vmem>>, vector<1x256xf32>
    %4 = vector.broadcast %3 : vector<1x256xf32> to vector<8x256xf32>
    %5 = arith.addf %2, %4 : vector<8x256xf32>
    %c0_5 = arith.constant 0 : index
    %c0_6 = arith.constant 0 : index
    %6 = vector.load %arg5[%c0_5, %c0_6] : memref<8x256xf32, #tpu.memory_space<vmem>>, vector<8x256xf32>
    tpu.vector_store %arg5[%c0_5, %c0_6], %5 {strides = array<i32>} : memref<8x256xf32, #tpu.memory_space<vmem>>, vector<8x256xf32>,
    %c0_7 = arith.constant 0 : index
    %c0_8 = arith.constant 0 : index
    %7 = vector.load %arg2[%c0_7, %c0_8] : memref<64x256xf32, #tpu.memory_space<vmem>>, vector<64x256xf32>
    %cst_9 = arith.constant 0.000000e+00 : f32
    %8 = vector.broadcast %cst_9 : f32 to vector<1x64xf32>
    %c0_i32 = arith.constant 0 : i32
    %9 = arith.index_cast %c0_i32 : i32 to index
    %c0_10 = arith.constant 0 : index
    %10 = vector.load %arg5[%9, %c0_10] : memref<8x256xf32, #tpu.memory_space<vmem>>, vector<1x256xf32>
    %cst_11 = arith.constant dense<0.000000e+00> : vector<1x256xf32>
    %11 = tpu.matmul %8, %7, %cst_11 {dimension_numbers = #tpu.dot_dimension_numbers<[1], [0], [0], [1], [0, 0, 1, 1], [], []>} : vector<1x64xf32>, vector<64x256xf32>, vector<1x256xf32> -> vector<1x256xf32>
    %12 = arith.addf %10, %11 : vector<1x256xf32>
    %13 = arith.negf %12 : vector<1x256xf32>
    %14 = math.exp %13 : vector<1x256xf32>
    %cst_12 = arith.constant 1.000000e+00 : f32
    %15 = vector.broadcast %cst_12 : f32 to vector<1x256xf32>
    %16 = arith.addf %15, %14 : vector<1x256xf32>
    %17 = arith.divf %15, %16 : vector<1x256xf32>
    %18 = math.tanh %12 : vector<1x256xf32>
    %19 = vector.extract_strided_slice %17 {offsets = [0, 0], sizes = [1, 64], strides = [1, 1]} : vector<1x256xf32> to vector<1x64xf32>
    %20 = vector.extract_strided_slice %17 {offsets = [0, 64], sizes = [1, 64], strides = [1, 1]} : vector<1x256xf32> to vector<1x64xf32>
    %21 = vector.extract_strided_slice %18 {offsets = [0, 128], sizes = [1, 64], strides = [1, 1]} : vector<1x256xf32> to vector<1x64xf32>
    %22 = vector.extract_strided_slice %17 {offsets = [0, 192], sizes = [1, 64], strides = [1, 1]} : vector<1x256xf32> to vector<1x64xf32>
    %23 = arith.mulf %20, %8 : vector<1x64xf32>
    %24 = arith.mulf %19, %21 : vector<1x64xf32>
    %25 = arith.addf %23, %24 : vector<1x64xf32>
    %26 = math.tanh %25 : vector<1x64xf32>
    %27 = arith.mulf %22, %26 : vector<1x64xf32>
    %28 = vector.extract_strided_slice %27 {offsets = [0, 0], sizes = [1, 32], strides = [1, 1]} : vector<1x64xf32> to vector<1x32xf32>
    %29 = arith.index_cast %c0_i32 : i32 to index
    %c0_13 = arith.constant 0 : index
    %30 = vector.load %arg4[%29, %c0_13] : memref<8x64xf32, #tpu.memory_space<vmem>>, vector<1x32xf32>
    tpu.vector_store %arg4[%29, %c0_13], %28 {strides = array<i32>} : memref<8x64xf32, #tpu.memory_space<vmem>>, vector<1x32xf32>,
    %31 = vector.extract_strided_slice %27 {offsets = [0, 32], sizes = [1, 32], strides = [1, 1]} : vector<1x64xf32> to vector<1x32xf32>
    %c7_i32 = arith.constant 7 : i32
    %32 = arith.subi %c7_i32, %c0_i32 : i32
    %33 = arith.index_cast %32 : i32 to index
    %c32 = arith.constant 32 : index
    %34 = vector.load %arg4[%33, %c32] : memref<8x64xf32, #tpu.memory_space<vmem>>, vector<1x32xf32>
    tpu.vector_store %arg4[%33, %c32], %31 {strides = array<i32>} : memref<8x64xf32, #tpu.memory_space<vmem>>, vector<1x32xf32>,
    %c1_i32 = arith.constant 1 : i32
    %35 = arith.index_cast %c1_i32 : i32 to index
    %c0_14 = arith.constant 0 : index
    %36 = vector.load %arg5[%35, %c0_14] : memref<8x256xf32, #tpu.memory_space<vmem>>, vector<1x256xf32>
    %cst_15 = arith.constant dense<0.000000e+00> : vector<1x256xf32>
    %37 = tpu.matmul %27, %7, %cst_15 {dimension_numbers = #tpu.dot_dimension_numbers<[1], [0], [0], [1], [0, 0, 1, 1], [], []>} : vector<1x64xf32>, vector<64x256xf32>, vector<1x256xf32> -> vector<1x256xf32>
    %38 = arith.addf %36, %37 : vector<1x256xf32>
    %39 = arith.negf %38 : vector<1x256xf32>
    %40 = math.exp %39 : vector<1x256xf32>
    %cst_16 = arith.constant 1.000000e+00 : f32
    %41 = vector.broadcast %cst_16 : f32 to vector<1x256xf32>
    %42 = arith.addf %41, %40 : vector<1x256xf32>
    %43 = arith.divf %41, %42 : vector<1x256xf32>
    %44 = math.tanh %38 : vector<1x256xf32>
    %45 = vector.extract_strided_slice %43 {offsets = [0, 0], sizes = [1, 64], strides = [1, 1]} : vector<1x256xf32> to vector<1x64xf32>
    %46 = vector.extract_strided_slice %43 {offsets = [0, 64], sizes = [1, 64], strides = [1, 1]} : vector<1x256xf32> to vector<1x64xf32>
    %47 = vector.extract_strided_slice %44 {offsets = [0, 128], sizes = [1, 64], strides = [1, 1]} : vector<1x256xf32> to vector<1x64xf32>
    %48 = vector.extract_strided_slice %43 {offsets = [0, 192], sizes = [1, 64], strides = [1, 1]} : vector<1x256xf32> to vector<1x64xf32>
    %49 = arith.mulf %46, %25 : vector<1x64xf32>
    %50 = arith.mulf %45, %47 : vector<1x64xf32>
    %51 = arith.addf %49, %50 : vector<1x64xf32>
    %52 = math.tanh %51 : vector<1x64xf32>
    %53 = arith.mulf %48, %52 : vector<1x64xf32>
    %54 = vector.extract_strided_slice %53 {offsets = [0, 0], sizes = [1, 32], strides = [1, 1]} : vector<1x64xf32> to vector<1x32xf32>
    %55 = arith.index_cast %c1_i32 : i32 to index
    %c0_17 = arith.constant 0 : index
    %56 = vector.load %arg4[%55, %c0_17] : memref<8x64xf32, #tpu.memory_space<vmem>>, vector<1x32xf32>
    tpu.vector_store %arg4[%55, %c0_17], %54 {strides = array<i32>} : memref<8x64xf32, #tpu.memory_space<vmem>>, vector<1x32xf32>,
    %57 = vector.extract_strided_slice %53 {offsets = [0, 32], sizes = [1, 32], strides = [1, 1]} : vector<1x64xf32> to vector<1x32xf32>
    %c7_i32_18 = arith.constant 7 : i32
    %58 = arith.subi %c7_i32_18, %c1_i32 : i32
    %59 = arith.index_cast %58 : i32 to index
    %c32_19 = arith.constant 32 : index
    %60 = vector.load %arg4[%59, %c32_19] : memref<8x64xf32, #tpu.memory_space<vmem>>, vector<1x32xf32>
    tpu.vector_store %arg4[%59, %c32_19], %57 {strides = array<i32>} : memref<8x64xf32, #tpu.memory_space<vmem>>, vector<1x32xf32>,
    %c2_i32 = arith.constant 2 : i32
    %61 = arith.index_cast %c2_i32 : i32 to index
    %c0_20 = arith.constant 0 : index
    %62 = vector.load %arg5[%61, %c0_20] : memref<8x256xf32, #tpu.memory_space<vmem>>, vector<1x256xf32>
    %cst_21 = arith.constant dense<0.000000e+00> : vector<1x256xf32>
    %63 = tpu.matmul %53, %7, %cst_21 {dimension_numbers = #tpu.dot_dimension_numbers<[1], [0], [0], [1], [0, 0, 1, 1], [], []>} : vector<1x64xf32>, vector<64x256xf32>, vector<1x256xf32> -> vector<1x256xf32>
    %64 = arith.addf %62, %63 : vector<1x256xf32>
    %65 = arith.negf %64 : vector<1x256xf32>
    %66 = math.exp %65 : vector<1x256xf32>
    %cst_22 = arith.constant 1.000000e+00 : f32
    %67 = vector.broadcast %cst_22 : f32 to vector<1x256xf32>
    %68 = arith.addf %67, %66 : vector<1x256xf32>
    %69 = arith.divf %67, %68 : vector<1x256xf32>
    %70 = math.tanh %64 : vector<1x256xf32>
    %71 = vector.extract_strided_slice %69 {offsets = [0, 0], sizes = [1, 64], strides = [1, 1]} : vector<1x256xf32> to vector<1x64xf32>
    %72 = vector.extract_strided_slice %69 {offsets = [0, 64], sizes = [1, 64], strides = [1, 1]} : vector<1x256xf32> to vector<1x64xf32>
    %73 = vector.extract_strided_slice %70 {offsets = [0, 128], sizes = [1, 64], strides = [1, 1]} : vector<1x256xf32> to vector<1x64xf32>
    %74 = vector.extract_strided_slice %69 {offsets = [0, 192], sizes = [1, 64], strides = [1, 1]} : vector<1x256xf32> to vector<1x64xf32>
    %75 = arith.mulf %72, %51 : vector<1x64xf32>
    %76 = arith.mulf %71, %73 : vector<1x64xf32>
    %77 = arith.addf %75, %76 : vector<1x64xf32>
    %78 = math.tanh %77 : vector<1x64xf32>
    %79 = arith.mulf %74, %78 : vector<1x64xf32>
    %80 = vector.extract_strided_slice %79 {offsets = [0, 0], sizes = [1, 32], strides = [1, 1]} : vector<1x64xf32> to vector<1x32xf32>
    %81 = arith.index_cast %c2_i32 : i32 to index
    %c0_23 = arith.constant 0 : index
    %82 = vector.load %arg4[%81, %c0_23] : memref<8x64xf32, #tpu.memory_space<vmem>>, vector<1x32xf32>
    tpu.vector_store %arg4[%81, %c0_23], %80 {strides = array<i32>} : memref<8x64xf32, #tpu.memory_space<vmem>>, vector<1x32xf32>,
    %83 = vector.extract_strided_slice %79 {offsets = [0, 32], sizes = [1, 32], strides = [1, 1]} : vector<1x64xf32> to vector<1x32xf32>
    %c7_i32_24 = arith.constant 7 : i32
    %84 = arith.subi %c7_i32_24, %c2_i32 : i32
    %85 = arith.index_cast %84 : i32 to index
    %c32_25 = arith.constant 32 : index
    %86 = vector.load %arg4[%85, %c32_25] : memref<8x64xf32, #tpu.memory_space<vmem>>, vector<1x32xf32>
    tpu.vector_store %arg4[%85, %c32_25], %83 {strides = array<i32>} : memref<8x64xf32, #tpu.memory_space<vmem>>, vector<1x32xf32>,
    %c3_i32 = arith.constant 3 : i32
    %87 = arith.index_cast %c3_i32 : i32 to index
    %c0_26 = arith.constant 0 : index
    %88 = vector.load %arg5[%87, %c0_26] : memref<8x256xf32, #tpu.memory_space<vmem>>, vector<1x256xf32>
    %cst_27 = arith.constant dense<0.000000e+00> : vector<1x256xf32>
    %89 = tpu.matmul %79, %7, %cst_27 {dimension_numbers = #tpu.dot_dimension_numbers<[1], [0], [0], [1], [0, 0, 1, 1], [], []>} : vector<1x64xf32>, vector<64x256xf32>, vector<1x256xf32> -> vector<1x256xf32>
    %90 = arith.addf %88, %89 : vector<1x256xf32>
    %91 = arith.negf %90 : vector<1x256xf32>
    %92 = math.exp %91 : vector<1x256xf32>
    %cst_28 = arith.constant 1.000000e+00 : f32
    %93 = vector.broadcast %cst_28 : f32 to vector<1x256xf32>
    %94 = arith.addf %93, %92 : vector<1x256xf32>
    %95 = arith.divf %93, %94 : vector<1x256xf32>
    %96 = math.tanh %90 : vector<1x256xf32>
    %97 = vector.extract_strided_slice %95 {offsets = [0, 0], sizes = [1, 64], strides = [1, 1]} : vector<1x256xf32> to vector<1x64xf32>
    %98 = vector.extract_strided_slice %95 {offsets = [0, 64], sizes = [1, 64], strides = [1, 1]} : vector<1x256xf32> to vector<1x64xf32>
    %99 = vector.extract_strided_slice %96 {offsets = [0, 128], sizes = [1, 64], strides = [1, 1]} : vector<1x256xf32> to vector<1x64xf32>
    %100 = vector.extract_strided_slice %95 {offsets = [0, 192], sizes = [1, 64], strides = [1, 1]} : vector<1x256xf32> to vector<1x64xf32>
    %101 = arith.mulf %98, %77 : vector<1x64xf32>
    %102 = arith.mulf %97, %99 : vector<1x64xf32>
    %103 = arith.addf %101, %102 : vector<1x64xf32>
    %104 = math.tanh %103 : vector<1x64xf32>
    %105 = arith.mulf %100, %104 : vector<1x64xf32>
    %106 = vector.extract_strided_slice %105 {offsets = [0, 0], sizes = [1, 32], strides = [1, 1]} : vector<1x64xf32> to vector<1x32xf32>
    %107 = arith.index_cast %c3_i32 : i32 to index
    %c0_29 = arith.constant 0 : index
    %108 = vector.load %arg4[%107, %c0_29] : memref<8x64xf32, #tpu.memory_space<vmem>>, vector<1x32xf32>
    tpu.vector_store %arg4[%107, %c0_29], %106 {strides = array<i32>} : memref<8x64xf32, #tpu.memory_space<vmem>>, vector<1x32xf32>,
    %109 = vector.extract_strided_slice %105 {offsets = [0, 32], sizes = [1, 32], strides = [1, 1]} : vector<1x64xf32> to vector<1x32xf32>
    %c7_i32_30 = arith.constant 7 : i32
    %110 = arith.subi %c7_i32_30, %c3_i32 : i32
    %111 = arith.index_cast %110 : i32 to index
    %c32_31 = arith.constant 32 : index
    %112 = vector.load %arg4[%111, %c32_31] : memref<8x64xf32, #tpu.memory_space<vmem>>, vector<1x32xf32>
    tpu.vector_store %arg4[%111, %c32_31], %109 {strides = array<i32>} : memref<8x64xf32, #tpu.memory_space<vmem>>, vector<1x32xf32>,
    %c4_i32 = arith.constant 4 : i32
    %113 = arith.index_cast %c4_i32 : i32 to index
    %c0_32 = arith.constant 0 : index
    %114 = vector.load %arg5[%113, %c0_32] : memref<8x256xf32, #tpu.memory_space<vmem>>, vector<1x256xf32>
    %cst_33 = arith.constant dense<0.000000e+00> : vector<1x256xf32>
    %115 = tpu.matmul %105, %7, %cst_33 {dimension_numbers = #tpu.dot_dimension_numbers<[1], [0], [0], [1], [0, 0, 1, 1], [], []>} : vector<1x64xf32>, vector<64x256xf32>, vector<1x256xf32> -> vector<1x256xf32>
    %116 = arith.addf %114, %115 : vector<1x256xf32>
    %117 = arith.negf %116 : vector<1x256xf32>
    %118 = math.exp %117 : vector<1x256xf32>
    %cst_34 = arith.constant 1.000000e+00 : f32
    %119 = vector.broadcast %cst_34 : f32 to vector<1x256xf32>
    %120 = arith.addf %119, %118 : vector<1x256xf32>
    %121 = arith.divf %119, %120 : vector<1x256xf32>
    %122 = math.tanh %116 : vector<1x256xf32>
    %123 = vector.extract_strided_slice %121 {offsets = [0, 0], sizes = [1, 64], strides = [1, 1]} : vector<1x256xf32> to vector<1x64xf32>
    %124 = vector.extract_strided_slice %121 {offsets = [0, 64], sizes = [1, 64], strides = [1, 1]} : vector<1x256xf32> to vector<1x64xf32>
    %125 = vector.extract_strided_slice %122 {offsets = [0, 128], sizes = [1, 64], strides = [1, 1]} : vector<1x256xf32> to vector<1x64xf32>
    %126 = vector.extract_strided_slice %121 {offsets = [0, 192], sizes = [1, 64], strides = [1, 1]} : vector<1x256xf32> to vector<1x64xf32>
    %127 = arith.mulf %124, %103 : vector<1x64xf32>
    %128 = arith.mulf %123, %125 : vector<1x64xf32>
    %129 = arith.addf %127, %128 : vector<1x64xf32>
    %130 = math.tanh %129 : vector<1x64xf32>
    %131 = arith.mulf %126, %130 : vector<1x64xf32>
    %132 = vector.extract_strided_slice %131 {offsets = [0, 0], sizes = [1, 32], strides = [1, 1]} : vector<1x64xf32> to vector<1x32xf32>
    %133 = arith.index_cast %c4_i32 : i32 to index
    %c0_35 = arith.constant 0 : index
    %134 = vector.load %arg4[%133, %c0_35] : memref<8x64xf32, #tpu.memory_space<vmem>>, vector<1x32xf32>
    tpu.vector_store %arg4[%133, %c0_35], %132 {strides = array<i32>} : memref<8x64xf32, #tpu.memory_space<vmem>>, vector<1x32xf32>,
    %135 = vector.extract_strided_slice %131 {offsets = [0, 32], sizes = [1, 32], strides = [1, 1]} : vector<1x64xf32> to vector<1x32xf32>
    %c7_i32_36 = arith.constant 7 : i32
    %136 = arith.subi %c7_i32_36, %c4_i32 : i32
    %137 = arith.index_cast %136 : i32 to index
    %c32_37 = arith.constant 32 : index
    %138 = vector.load %arg4[%137, %c32_37] : memref<8x64xf32, #tpu.memory_space<vmem>>, vector<1x32xf32>
    tpu.vector_store %arg4[%137, %c32_37], %135 {strides = array<i32>} : memref<8x64xf32, #tpu.memory_space<vmem>>, vector<1x32xf32>,
    %c5_i32 = arith.constant 5 : i32
    %139 = arith.index_cast %c5_i32 : i32 to index
    %c0_38 = arith.constant 0 : index
    %140 = vector.load %arg5[%139, %c0_38] : memref<8x256xf32, #tpu.memory_space<vmem>>, vector<1x256xf32>
    %cst_39 = arith.constant dense<0.000000e+00> : vector<1x256xf32>
    %141 = tpu.matmul %131, %7, %cst_39 {dimension_numbers = #tpu.dot_dimension_numbers<[1], [0], [0], [1], [0, 0, 1, 1], [], []>} : vector<1x64xf32>, vector<64x256xf32>, vector<1x256xf32> -> vector<1x256xf32>
    %142 = arith.addf %140, %141 : vector<1x256xf32>
    %143 = arith.negf %142 : vector<1x256xf32>
    %144 = math.exp %143 : vector<1x256xf32>
    %cst_40 = arith.constant 1.000000e+00 : f32
    %145 = vector.broadcast %cst_40 : f32 to vector<1x256xf32>
    %146 = arith.addf %145, %144 : vector<1x256xf32>
    %147 = arith.divf %145, %146 : vector<1x256xf32>
    %148 = math.tanh %142 : vector<1x256xf32>
    %149 = vector.extract_strided_slice %147 {offsets = [0, 0], sizes = [1, 64], strides = [1, 1]} : vector<1x256xf32> to vector<1x64xf32>
    %150 = vector.extract_strided_slice %147 {offsets = [0, 64], sizes = [1, 64], strides = [1, 1]} : vector<1x256xf32> to vector<1x64xf32>
    %151 = vector.extract_strided_slice %148 {offsets = [0, 128], sizes = [1, 64], strides = [1, 1]} : vector<1x256xf32> to vector<1x64xf32>
    %152 = vector.extract_strided_slice %147 {offsets = [0, 192], sizes = [1, 64], strides = [1, 1]} : vector<1x256xf32> to vector<1x64xf32>
    %153 = arith.mulf %150, %129 : vector<1x64xf32>
    %154 = arith.mulf %149, %151 : vector<1x64xf32>
    %155 = arith.addf %153, %154 : vector<1x64xf32>
    %156 = math.tanh %155 : vector<1x64xf32>
    %157 = arith.mulf %152, %156 : vector<1x64xf32>
    %158 = vector.extract_strided_slice %157 {offsets = [0, 0], sizes = [1, 32], strides = [1, 1]} : vector<1x64xf32> to vector<1x32xf32>
    %159 = arith.index_cast %c5_i32 : i32 to index
    %c0_41 = arith.constant 0 : index
    %160 = vector.load %arg4[%159, %c0_41] : memref<8x64xf32, #tpu.memory_space<vmem>>, vector<1x32xf32>
    tpu.vector_store %arg4[%159, %c0_41], %158 {strides = array<i32>} : memref<8x64xf32, #tpu.memory_space<vmem>>, vector<1x32xf32>,
    %161 = vector.extract_strided_slice %157 {offsets = [0, 32], sizes = [1, 32], strides = [1, 1]} : vector<1x64xf32> to vector<1x32xf32>
    %c7_i32_42 = arith.constant 7 : i32
    %162 = arith.subi %c7_i32_42, %c5_i32 : i32
    %163 = arith.index_cast %162 : i32 to index
    %c32_43 = arith.constant 32 : index
    %164 = vector.load %arg4[%163, %c32_43] : memref<8x64xf32, #tpu.memory_space<vmem>>, vector<1x32xf32>
    tpu.vector_store %arg4[%163, %c32_43], %161 {strides = array<i32>} : memref<8x64xf32, #tpu.memory_space<vmem>>, vector<1x32xf32>,
    %c6_i32 = arith.constant 6 : i32
    %165 = arith.index_cast %c6_i32 : i32 to index
    %c0_44 = arith.constant 0 : index
    %166 = vector.load %arg5[%165, %c0_44] : memref<8x256xf32, #tpu.memory_space<vmem>>, vector<1x256xf32>
    %cst_45 = arith.constant dense<0.000000e+00> : vector<1x256xf32>
    %167 = tpu.matmul %157, %7, %cst_45 {dimension_numbers = #tpu.dot_dimension_numbers<[1], [0], [0], [1], [0, 0, 1, 1], [], []>} : vector<1x64xf32>, vector<64x256xf32>, vector<1x256xf32> -> vector<1x256xf32>
    %168 = arith.addf %166, %167 : vector<1x256xf32>
    %169 = arith.negf %168 : vector<1x256xf32>
    %170 = math.exp %169 : vector<1x256xf32>
    %cst_46 = arith.constant 1.000000e+00 : f32
    %171 = vector.broadcast %cst_46 : f32 to vector<1x256xf32>
    %172 = arith.addf %171, %170 : vector<1x256xf32>
    %173 = arith.divf %171, %172 : vector<1x256xf32>
    %174 = math.tanh %168 : vector<1x256xf32>
    %175 = vector.extract_strided_slice %173 {offsets = [0, 0], sizes = [1, 64], strides = [1, 1]} : vector<1x256xf32> to vector<1x64xf32>
    %176 = vector.extract_strided_slice %173 {offsets = [0, 64], sizes = [1, 64], strides = [1, 1]} : vector<1x256xf32> to vector<1x64xf32>
    %177 = vector.extract_strided_slice %174 {offsets = [0, 128], sizes = [1, 64], strides = [1, 1]} : vector<1x256xf32> to vector<1x64xf32>
    %178 = vector.extract_strided_slice %173 {offsets = [0, 192], sizes = [1, 64], strides = [1, 1]} : vector<1x256xf32> to vector<1x64xf32>
    %179 = arith.mulf %176, %155 : vector<1x64xf32>
    %180 = arith.mulf %175, %177 : vector<1x64xf32>
    %181 = arith.addf %179, %180 : vector<1x64xf32>
    %182 = math.tanh %181 : vector<1x64xf32>
    %183 = arith.mulf %178, %182 : vector<1x64xf32>
    %184 = vector.extract_strided_slice %183 {offsets = [0, 0], sizes = [1, 32], strides = [1, 1]} : vector<1x64xf32> to vector<1x32xf32>
    %185 = arith.index_cast %c6_i32 : i32 to index
    %c0_47 = arith.constant 0 : index
    %186 = vector.load %arg4[%185, %c0_47] : memref<8x64xf32, #tpu.memory_space<vmem>>, vector<1x32xf32>
    tpu.vector_store %arg4[%185, %c0_47], %184 {strides = array<i32>} : memref<8x64xf32, #tpu.memory_space<vmem>>, vector<1x32xf32>,
    %187 = vector.extract_strided_slice %183 {offsets = [0, 32], sizes = [1, 32], strides = [1, 1]} : vector<1x64xf32> to vector<1x32xf32>
    %c7_i32_48 = arith.constant 7 : i32
    %188 = arith.subi %c7_i32_48, %c6_i32 : i32
    %189 = arith.index_cast %188 : i32 to index
    %c32_49 = arith.constant 32 : index
    %190 = vector.load %arg4[%189, %c32_49] : memref<8x64xf32, #tpu.memory_space<vmem>>, vector<1x32xf32>
    tpu.vector_store %arg4[%189, %c32_49], %187 {strides = array<i32>} : memref<8x64xf32, #tpu.memory_space<vmem>>, vector<1x32xf32>,
    %c7_i32_50 = arith.constant 7 : i32
    %191 = arith.index_cast %c7_i32_50 : i32 to index
    %c0_51 = arith.constant 0 : index
    %192 = vector.load %arg5[%191, %c0_51] : memref<8x256xf32, #tpu.memory_space<vmem>>, vector<1x256xf32>
    %cst_52 = arith.constant dense<0.000000e+00> : vector<1x256xf32>
    %193 = tpu.matmul %183, %7, %cst_52 {dimension_numbers = #tpu.dot_dimension_numbers<[1], [0], [0], [1], [0, 0, 1, 1], [], []>} : vector<1x64xf32>, vector<64x256xf32>, vector<1x256xf32> -> vector<1x256xf32>
    %194 = arith.addf %192, %193 : vector<1x256xf32>
    %195 = arith.negf %194 : vector<1x256xf32>
    %196 = math.exp %195 : vector<1x256xf32>
    %cst_53 = arith.constant 1.000000e+00 : f32
    %197 = vector.broadcast %cst_53 : f32 to vector<1x256xf32>
    %198 = arith.addf %197, %196 : vector<1x256xf32>
    %199 = arith.divf %197, %198 : vector<1x256xf32>
    %200 = math.tanh %194 : vector<1x256xf32>
    %201 = vector.extract_strided_slice %199 {offsets = [0, 0], sizes = [1, 64], strides = [1, 1]} : vector<1x256xf32> to vector<1x64xf32>
    %202 = vector.extract_strided_slice %199 {offsets = [0, 64], sizes = [1, 64], strides = [1, 1]} : vector<1x256xf32> to vector<1x64xf32>
    %203 = vector.extract_strided_slice %200 {offsets = [0, 128], sizes = [1, 64], strides = [1, 1]} : vector<1x256xf32> to vector<1x64xf32>
    %204 = vector.extract_strided_slice %199 {offsets = [0, 192], sizes = [1, 64], strides = [1, 1]} : vector<1x256xf32> to vector<1x64xf32>
    %205 = arith.mulf %202, %181 : vector<1x64xf32>
    %206 = arith.mulf %201, %203 : vector<1x64xf32>
    %207 = arith.addf %205, %206 : vector<1x64xf32>
    %208 = math.tanh %207 : vector<1x64xf32>
    %209 = arith.mulf %204, %208 : vector<1x64xf32>
    %210 = vector.extract_strided_slice %209 {offsets = [0, 0], sizes = [1, 32], strides = [1, 1]} : vector<1x64xf32> to vector<1x32xf32>
    %211 = arith.index_cast %c7_i32_50 : i32 to index
    %c0_54 = arith.constant 0 : index
    %212 = vector.load %arg4[%211, %c0_54] : memref<8x64xf32, #tpu.memory_space<vmem>>, vector<1x32xf32>
    tpu.vector_store %arg4[%211, %c0_54], %210 {strides = array<i32>} : memref<8x64xf32, #tpu.memory_space<vmem>>, vector<1x32xf32>,
    %213 = vector.extract_strided_slice %209 {offsets = [0, 32], sizes = [1, 32], strides = [1, 1]} : vector<1x64xf32> to vector<1x32xf32>
    %c7_i32_55 = arith.constant 7 : i32
    %214 = arith.subi %c7_i32_55, %c7_i32_50 : i32
    %215 = arith.index_cast %214 : i32 to index
    %c32_56 = arith.constant 32 : index
    %216 = vector.load %arg4[%215, %c32_56] : memref<8x64xf32, #tpu.memory_space<vmem>>, vector<1x32xf32>
    tpu.vector_store %arg4[%215, %c32_56], %213 {strides = array<i32>} : memref<8x64xf32, #tpu.memory_space<vmem>>, vector<1x32xf32>,
    %c8_i32 = arith.constant 8 : i32
    return
  }
}

</mosaic_0001>

<bundles_post_ra>
// kernel: encoder_forward.1
= control target key start
LH: loop header
LB: loop body
LE: loop exit
PB: predicated region body
PF: predicated region fallthrough
CT: control target
= control target key end

     0   :  { %s1347_s0 = inlined_call_operand.vmem [shape: f32[8,64], index: 0, kind: input, shape index: {}]   ;;  %s1348_s1 = inlined_call_operand.vmem [shape: f32[64,256], index: 1, kind: input, shape index: {}]   ;;  %s1349_s2 = inlined_call_operand.vmem [shape: f32[64,256], index: 2, kind: input, shape index: {}]   ;;  %s1350_s3 = inlined_call_operand.vmem [shape: f32[1,256], index: 3, kind: input, shape index: {}]   ;;  %s1351_s4 = inlined_call_operand.hbm [shape: f32[8,64], index: 4, kind: output, shape index: {}]  }
   0x1   :  { %v33_v0 = vld [vmem:[%s1348_s1 + $0x70] sm:$0xff]  ;;  %v34_v1 = vld [vmem:[%s1348_s1 + $0x78] sm:$0xff]  ;;  %v31_v3 = vld [vmem:[%s1348_s1 + $0x60] sm:$0xff] }
   0x2   :  { %v1027_v2 = vld [vmem:[%s1349_s2 + $0x78] sm:$0xff]  ;;  %53 = vmatpush.msra.mxu0 %v33_v0  ;;  %73 = vmatpush.msra.mxu1 %v34_v1  ;;  %v32_v4 = vld [vmem:[%s1348_s1 + $0x68] sm:$0xff]  ;;  %v1038_v5 = vld [vmem:[%s1349_s2 + $0x70] sm:$0xff] }
   0x3   :  { %135 = vmatpush.msra.mxu3 %v1027_v2  ;;  %115 = vmatpush.msra.mxu2 %v1038_v5  ;;  %v1045_v6 = vld [vmem:[%s1349_s2 + $0x68] sm:$0xff]  ;;  %v29_v7 = vld [vmem:[%s1348_s1 + $0x50] sm:$0xff]  ;;  %v30_v8 = vld [vmem:[%s1348_s1 + $0x58] sm:$0xff] }
   0x4   :  { %54 = vmatpush.msra.mxu0 %v31_v3  ;;  %74 = vmatpush.msra.mxu1 %v32_v4  ;;  %v1056_v9 = vld [vmem:[%s1349_s2 + $0x60] sm:$0xff]  ;;  %v1061_v10 = vld [vmem:[%s1349_s2 + $0x58] sm:$0xff]  ;;  %v28_v12 = vld [vmem:[%s1348_s1 + $0x48] sm:$0xff] }
   0x5   :  { %136 = vmatpush.msra.mxu3 %v1045_v6  ;;  %116 = vmatpush.msra.mxu2 %v1056_v9  ;;  %v27_v11 = vld [vmem:[%s1348_s1 + $0x40] sm:$0xff]  ;;  %v1074_v13 = vld [vmem:[%s1349_s2 + $0x50] sm:$0xff]  ;;  %v1079_v14 = vld [vmem:[%s1349_s2 + $0x48] sm:$0xff] }
   0x6   :  { %55 = vmatpush.msra.mxu0 %v29_v7  ;;  %75 = vmatpush.msra.mxu1 %v30_v8  ;;  %v1084_v15 = vld [vmem:[%s1349_s2 + $0x40] sm:$0xff]  ;;  %v25_v16 = vld [vmem:[%s1348_s1 + $0x30] sm:$0xff]  ;;  %v26_v17 = vld [vmem:[%s1348_s1 + $0x38] sm:$0xff] }
   0x7   :  { %137 = vmatpush.msra.mxu3 %v1061_v10  ;;  %117 = vmatpush.msra.mxu2 %v1074_v13  ;;  %v1097_v18 = vld [vmem:[%s1349_s2 + $0x38] sm:$0xff]  ;;  %v1102_v19 = vld [vmem:[%s1349_s2 + $0x30] sm:$0xff]  ;;  %v23_v20 = vld [vmem:[%s1348_s1 + $0x20] sm:$0xff] }
   0x8   :  { %56 = vmatpush.msra.mxu0 %v27_v11  ;;  %76 = vmatpush.msra.mxu1 %v28_v12  ;;  %v24_v21 = vld [vmem:[%s1348_s1 + $0x28] sm:$0xff]  ;;  %v1120_v23 = vld [vmem:[%s1349_s2 + $0x20] sm:$0xff]  ;;  %v21_v24 = vld [vmem:[%s1348_s1 + $0x10] sm:$0xff] }
   0x9   :  { %138 = vmatpush.msra.mxu3 %v1079_v14  ;;  %118 = vmatpush.msra.mxu2 %v1084_v15  ;;  %v1115_v22 = vld [vmem:[%s1349_s2 + $0x28] sm:$0xff]  ;;  %v22_v25 = vld [vmem:[%s1348_s1 + $0x18] sm:$0xff]  ;;  %v1138_v27 = vld [vmem:[%s1349_s2 + $0x10] sm:$0xff] }
   0xa   :  { %57 = vmatpush.msra.mxu0 %v25_v16  ;;  %77 = vmatpush.msra.mxu1 %v26_v17  ;;  %v1133_v26 = vld [vmem:[%s1349_s2 + $0x18] sm:$0xff] }
   0xb   :  { %139 = vmatpush.msra.mxu3 %v1097_v18  ;;  %119 = vmatpush.msra.mxu2 %v1102_v19 }
   0xc   :  { %58 = vmatpush.msra.mxu0 %v23_v20  ;;  %78 = vmatpush.msra.mxu1 %v24_v21 }
   0xd   :  { %9 = vsyncpa [#allocation4], 0  ;;  %140 = vmatpush.msra.mxu3 %v1115_v22  ;;  %120 = vmatpush.msra.mxu2 %v1120_v23  ;;  %v19_v28 = vld [vmem:[%s1348_s1] sm:$0xff]  ;;  %v20_v29 = vld [vmem:[%s1348_s1 + $0x8] sm:$0xff]  ;;  %vm41_vm0 = vcmask 523264   ;;  %v990_v33 = vmov 0.0  }
   0xe   :  { %59 = vmatpush.msra.mxu0 %v21_v24  ;;  %79 = vmatpush.msra.mxu1 %v22_v25  ;;  %v18_v30 = vld [vmem:[%s1347_s0] sm:$0xff]  ;;  %v1156_v31 = vld [vmem:[%s1349_s2 + $0x8] sm:$0xff]  ;;  %vm150_vm1 = vcmask 1040384   ;;  %vm195_vm6 = vcmask 253952   ;;  %vm197_vm7 = vcmask 516352   ;;  %s864_s6 = sshll.u32 %s1351_s4, 4  ;;  %s865_s6 = int_to_ptr.hbm [resolvable:$true] %s864_s6 }
   0xf   :  { %141 = vmatpush.msra.mxu3 %v1133_v26  ;;  %121 = vmatpush.msra.mxu2 %v1138_v27  ;;  %v1161_v32 = vld [vmem:[%s1349_s2] sm:$0xff]  ;;  %s991_s2 = smov 64  }
  0x10   :  { %60 = vmatpush.msra.mxu0 %v19_v28  ;;  %80 = vmatpush.msra.mxu1 %v20_v29  ;;  %v35_v34 = vld [vmem:[%s1350_s3] sm:$0x3]  ;;  %s992_s3 = smov [#allocation3]  }
  0x11   :  { %873 = vmatmul.msk.f32.vlgmr.msra.gmra.mxu0 %vm41_vm0, %v18_v30  ;;  %874 = vmatmul.msk.f32.vlgmr.msra.gmra.mxu1 %vm41_vm0, %v18_v30  ;;  %v37_v35 = vperm.slane %v35_v34, 0  ;;  %v38_v36 = vperm.slane %v35_v34, 1  ;;  %s862_s29 = sshll.u32 %s992_s3, 4  ;;  %s863_s29 = int_to_ptr.vmem [resolvable:$true] %s862_s29 }
  0x12   :  { %142 = vmatpush.msra.mxu3 %v1156_v31  ;;  %122 = vmatpush.msra.mxu2 %v1161_v32 }
  0x13   :  { %143 = vmatmul.f32.vlgmr.msra.gmra.mxu3 %v990_v33  ;;  %123 = vmatmul.f32.vlgmr.msra.gmra.mxu2 %v990_v33 }
  0x14   :  { %212 = vmatpush.msrb.mxu0 %v1038_v5  ;;  %232 = vmatpush.msrb.mxu1 %v1027_v2 }
  0x15   :  { %306 = vmatpush.msrb.mxu2 %v1038_v5  ;;  %326 = vmatpush.msrb.mxu3 %v1027_v2 }
  0x16   :  { %213 = vmatpush.msrb.mxu0 %v1056_v9  ;;  %233 = vmatpush.msrb.mxu1 %v1045_v6 }
  0x17   :  { %307 = vmatpush.msrb.mxu2 %v1056_v9  ;;  %327 = vmatpush.msrb.mxu3 %v1045_v6 }
  0x18   :  { %214 = vmatpush.msrb.mxu0 %v1074_v13  ;;  %234 = vmatpush.msrb.mxu1 %v1061_v10 }
  0x19   :  { %308 = vmatpush.msrb.mxu2 %v1074_v13  ;;  %328 = vmatpush.msrb.mxu3 %v1061_v10 }
  0x1a   :  { %215 = vmatpush.msrb.mxu0 %v1084_v15  ;;  %235 = vmatpush.msrb.mxu1 %v1079_v14 }
  0x1b   :  { %309 = vmatpush.msrb.mxu2 %v1084_v15  ;;  %329 = vmatpush.msrb.mxu3 %v1079_v14 }
  0x1c   :  { %216 = vmatpush.msrb.mxu0 %v1102_v19  ;;  %236 = vmatpush.msrb.mxu1 %v1097_v18 }
  0x1d   :  { %310 = vmatpush.msrb.mxu2 %v1102_v19  ;;  %330 = vmatpush.msrb.mxu3 %v1097_v18 }
  0x1e   :  { %217 = vmatpush.msrb.mxu0 %v1120_v23  ;;  %237 = vmatpush.msrb.mxu1 %v1115_v22 }
  0x1f   :  { %311 = vmatpush.msrb.mxu2 %v1120_v23  ;;  %331 = vmatpush.msrb.mxu3 %v1115_v22 }
  0x20   :  { %218 = vmatpush.msrb.mxu0 %v1138_v27  ;;  %238 = vmatpush.msrb.mxu1 %v1133_v26 }
  0x21   :  { %312 = vmatpush.msrb.mxu2 %v1138_v27  ;;  %332 = vmatpush.msrb.mxu3 %v1133_v26 }
  0x22   :  { %219 = vmatpush.msrb.mxu0 %v1161_v32  ;;  %239 = vmatpush.msrb.mxu1 %v1156_v31 }
  0x23   :  { %313 = vmatpush.msrb.mxu2 %v1161_v32  ;;  %333 = vmatpush.msrb.mxu3 %v1156_v31 }
  0x24   :  { %400 = vmatpush.msra.mxu0 %v1038_v5  ;;  %420 = vmatpush.msra.mxu1 %v1027_v2 }
  0x25   :  { %494 = vmatpush.msra.mxu2 %v1038_v5  ;;  %514 = vmatpush.msra.mxu3 %v1027_v2 }
  0x26   :  { %401 = vmatpush.msra.mxu0 %v1056_v9  ;;  %421 = vmatpush.msra.mxu1 %v1045_v6 }
  0x27   :  { %495 = vmatpush.msra.mxu2 %v1056_v9  ;;  %515 = vmatpush.msra.mxu3 %v1045_v6 }
  0x28   :  { %402 = vmatpush.msra.mxu0 %v1074_v13  ;;  %422 = vmatpush.msra.mxu1 %v1061_v10 }
  0x29   :  { %496 = vmatpush.msra.mxu2 %v1074_v13  ;;  %516 = vmatpush.msra.mxu3 %v1061_v10 }
  0x2a   :  { %403 = vmatpush.msra.mxu0 %v1084_v15  ;;  %423 = vmatpush.msra.mxu1 %v1079_v14 }
  0x2b   :  { %497 = vmatpush.msra.mxu2 %v1084_v15  ;;  %517 = vmatpush.msra.mxu3 %v1079_v14 }
  0x2c   :  { %404 = vmatpush.msra.mxu0 %v1102_v19  ;;  %424 = vmatpush.msra.mxu1 %v1097_v18 }
  0x2d   :  { %498 = vmatpush.msra.mxu2 %v1102_v19  ;;  %518 = vmatpush.msra.mxu3 %v1097_v18 }
  0x2e   :  { %405 = vmatpush.msra.mxu0 %v1120_v23  ;;  %425 = vmatpush.msra.mxu1 %v1115_v22 }
  0x2f   :  { %499 = vmatpush.msra.mxu2 %v1120_v23  ;;  %519 = vmatpush.msra.mxu3 %v1115_v22 }
  0x30   :  { %406 = vmatpush.msra.mxu0 %v1138_v27  ;;  %426 = vmatpush.msra.mxu1 %v1133_v26 }
  0x31   :  { %500 = vmatpush.msra.mxu2 %v1138_v27  ;;  %520 = vmatpush.msra.mxu3 %v1133_v26 }
  0x32   :  { %407 = vmatpush.msra.mxu0 %v1161_v32  ;;  %427 = vmatpush.msra.mxu1 %v1156_v31 }
  0x33   :  { %501 = vmatpush.msra.mxu2 %v1161_v32  ;;  %521 = vmatpush.msra.mxu3 %v1156_v31 }
  0x8e   :  { %v62_v37 = vpop.f32.mrf.mxu0  ;;  %v82_v38 = vpop.f32.mrf.mxu1 }
  0x8f   :  { %v63_v39 = vadd.f32 %v62_v37, %v37_v35  ;;  %v83_v40 = vadd.f32 %v82_v38, %v38_v36 }
  0x91   :  { %85 = vst [vmem:[#allocation2] sm:$0xff] %v63_v39 }
  0x92   :  { %86 = vst [vmem:[#allocation2 + $0x8] sm:$0xff] %v83_v40 }
  0x96   :  { %v144_v41 = vpop.f32.mrf.mxu3  ;;  %v124_v42 = vpop.f32.mrf.mxu2 }
  0x97   :  { %v149_v43 = vrot.slane %v144_v41, 7 }
  0x99   :  { %v103_v44 = vld [vmem:[#allocation2] ss:$8 sm:$0x3]  ;;  %v151_v45 = vsel %vm150_vm1, %v124_v42, %v149_v43  ;;  %v200_v20 = vld [vmem:[#allocation2 + $0x1] ss:$8 sm:$0x3] }
  0x9a   :  { %v153_v46 = vadd.f32 %v151_v45, %v103_v44 }
  0x9c   :  { %v875_v47 = vmul.f32 -1.442695, %v153_v46 }
  0x9e   :  { %900 = vpow2.f32 %v875_v47 }
  0xa4   :  { %v901_v48 = vpop.eup %900 }
  0xa5   :  { %v157_v49 = vadd.f32 1.0, %v901_v48 }
  0xa7   :  { %902 = vrcp.f32 %v157_v49  ;;  %v169_v53 = vand.u32 2147483648, %v157_v49  ;;  %v167_v55 = vand.u32 2147483647, %v157_v49  ;;  %vm163_vm3 = vweird.f32 %v157_v49 }
  0xa8   :  { %904 = vtanh.f32 %v153_v46 }
  0xa9   :  { %v170_v58 = vor.u32 1.1754944e-38, %v169_v53  ;;  %vm168_vm5 = vcmp.eq.f32.partialorder %v167_v55, 8.507059e+37 }
  0xad   :  { %v903_v50 = vpop.eup %902 }
  0xae   :  { %v159_v51 = vmul.f32 %v903_v50, %v157_v49  ;;  %vm164_vm2 = vweird.f32 %v903_v50  ;;  %v905_v56 = vpop.eup %904 }
  0xaf   :  { %vm165_vm4 = vmor %vm163_vm3, %vm164_vm2  ;;  %v176_v60 = vrot.slane %v905_v56, 1  ;;  %v294_v56 = vld [vmem:[#allocation2 + $0x2] ss:$8 sm:$0x3] }
  0xb0   :  { %v160_v52 = vsub.f32 1.0, %v159_v51 }
  0xb2   :  { %v161_v54 = vmul.f32 %v903_v50, %v160_v52 }
  0xb4   :  { %v162_v57 = vadd.f32 %v903_v50, %v161_v54 }
  0xb6   :  { %v166_v59 = vsel %vm165_vm4, %v903_v50, %v162_v57 }
  0xb7   :  { %v171_v61 = vsel %vm168_vm5, %v170_v58, %v166_v59 }
  0xb8   :  { %v178_v62 = vmul.f32 %v176_v60, %v171_v61  ;;  %v174_v63 = vmul.f32 0.0, %v171_v61 }
  0xba   :  { %180 = vrot.lane.b32.xlu0 %v178_v62, %s991_s2 }
  0xc2   :  { %186 = vrot.lane.b32.xlu0 %v171_v61, %s991_s2 }
 0x12c   :  { %v181_v0 = vpop.permute.xlu0 %180 }
 0x12d   :  { %v183_v1 = vadd.f32 %v181_v0, %v174_v63 }
 0x12f   :  { %906 = vtanh.f32 %v183_v1 }
 0x134   :  { %v187_v4 = vpop.permute.xlu0 %186 }
 0x135   :  { %v907_v3 = vpop.eup %906  ;;  %v188_v7 = vrot.slane %v187_v4, 1 }
 0x136   :  { %191 = vrot.lane.b32.xlu1 %v907_v3, %s991_s2 }
 0x1a8   :  { %v192_v8 = vpop.permute.xlu1 %191 }
 0x1a9   :  { %v194_v11 = vmul.f32 %v192_v8, %v188_v7 }
 0x1ab   :  { %876 = vmatmul.msk.f32.vlgmr.msrb.gmra.mxu0 %vm41_vm0, %v194_v11  ;;  %877 = vmatmul.msk.f32.vlgmr.msrb.gmra.mxu1 %vm41_vm0, %v194_v11  ;;  %196 = vst.msk [vmem:[#allocation3] sm:$0x1] %vm195_vm6, %v194_v11 }
 0x1ac   :  { %198 = vst.msk [vmem:[#allocation3 + $0x7] sm:$0x1] %vm197_vm7, %v194_v11  ;;  %588 = vmatpush.msrb.mxu0 %v1038_v5  ;;  %608 = vmatpush.msrb.mxu1 %v1027_v2 }
 0x1ae   :  { %589 = vmatpush.msrb.mxu0 %v1056_v9  ;;  %609 = vmatpush.msrb.mxu1 %v1045_v6 }
 0x1b0   :  { %590 = vmatpush.msrb.mxu0 %v1074_v13  ;;  %610 = vmatpush.msrb.mxu1 %v1061_v10 }
 0x1b2   :  { %591 = vmatpush.msrb.mxu0 %v1084_v15  ;;  %611 = vmatpush.msrb.mxu1 %v1079_v14 }
 0x1b4   :  { %592 = vmatpush.msrb.mxu0 %v1102_v19  ;;  %612 = vmatpush.msrb.mxu1 %v1097_v18 }
 0x1b6   :  { %593 = vmatpush.msrb.mxu0 %v1120_v23  ;;  %613 = vmatpush.msrb.mxu1 %v1115_v22 }
 0x1b8   :  { %594 = vmatpush.msrb.mxu0 %v1138_v27  ;;  %614 = vmatpush.msrb.mxu1 %v1133_v26 }
 0x1ba   :  { %595 = vmatpush.msrb.mxu0 %v1161_v32  ;;  %615 = vmatpush.msrb.mxu1 %v1156_v31 }
 0x228   :  { %v241_v12 = vpop.f32.mrf.mxu1  ;;  %v221_v17 = vpop.f32.mrf.mxu0 }
 0x229   :  { %v246_v16 = vrot.slane %v241_v12, 7 }
 0x22b   :  { %v247_v21 = vsel %vm150_vm1, %v221_v17, %v246_v16 }
 0x22c   :  { %v249_v24 = vadd.f32 %v247_v21, %v200_v20 }
 0x22e   :  { %v878_v25 = vmul.f32 -1.442695, %v249_v24 }
 0x230   :  { %908 = vpow2.f32 %v878_v25 }
 0x236   :  { %v909_v28 = vpop.eup %908 }
 0x237   :  { %v253_v29 = vadd.f32 1.0, %v909_v28 }
 0x239   :  { %910 = vrcp.f32 %v253_v29  ;;  %v265_v35 = vand.u32 2147483648, %v253_v29  ;;  %v263_v37 = vand.u32 2147483647, %v253_v29  ;;  %vm259_vm9 = vweird.f32 %v253_v29 }
 0x23a   :  { %912 = vtanh.f32 %v249_v24 }
 0x23b   :  { %v266_v40 = vor.u32 1.1754944e-38, %v265_v35  ;;  %vm264_vm11 = vcmp.eq.f32.partialorder %v263_v37, 8.507059e+37 }
 0x23f   :  { %v911_v30 = vpop.eup %910 }
 0x240   :  { %v255_v33 = vmul.f32 %v911_v30, %v253_v29  ;;  %vm260_vm8 = vweird.f32 %v911_v30  ;;  %v913_v38 = vpop.eup %912 }
 0x241   :  { %vm261_vm10 = vmor %vm259_vm9, %vm260_vm8  ;;  %v272_v42 = vrot.slane %v913_v38, 1 }
 0x242   :  { %v256_v34 = vsub.f32 1.0, %v255_v33 }
 0x244   :  { %v257_v36 = vmul.f32 %v911_v30, %v256_v34 }
 0x246   :  { %v258_v39 = vadd.f32 %v911_v30, %v257_v36 }
 0x248   :  { %v262_v41 = vsel %vm261_vm10, %v911_v30, %v258_v39 }
 0x249   :  { %v267_v43 = vsel %vm264_vm11, %v266_v40, %v262_v41 }
 0x24a   :  { %282 = vrot.lane.b32.xlu2 %v267_v43, %s991_s2  ;;  %v274_v44 = vmul.f32 %v272_v42, %v267_v43  ;;  %v270_v45 = vmul.f32 %v267_v43, %v183_v1 }
 0x24c   :  { %276 = vrot.lane.b32.xlu1 %v274_v44, %s991_s2 }
 0x2a4   :  { %v283_v49 = vpop.permute.xlu2 %282 }
 0x2a5   :  { %v284_v50 = vrot.slane %v283_v49, 1 }
 0x2be   :  { %v277_v46 = vpop.permute.xlu1 %276 }
 0x2bf   :  { %v279_v47 = vadd.f32 %v277_v46, %v270_v45 }
 0x2c1   :  { %914 = vtanh.f32 %v279_v47 }
 0x2c7   :  { %v915_v48 = vpop.eup %914 }
 0x2c8   :  { %287 = vrot.lane.b32.xlu2 %v915_v48, %s991_s2 }
 0x322   :  { %v288_v51 = vpop.permute.xlu2 %287 }
 0x323   :  { %v290_v52 = vmul.f32 %v288_v51, %v284_v50 }
 0x325   :  { %291 = vst.msk [vmem:[#allocation3 + $0x1] sm:$0x1] %vm195_vm6, %v290_v52  ;;  %879 = vmatmul.msk.f32.vlgmr.msrb.gmra.mxu2 %vm41_vm0, %v290_v52  ;;  %880 = vmatmul.msk.f32.vlgmr.msrb.gmra.mxu3 %vm41_vm0, %v290_v52 }
 0x326   :  { %292 = vst.msk [vmem:[#allocation3 + $0x6] sm:$0x1] %vm197_vm7, %v290_v52  ;;  %682 = vmatpush.msrb.mxu2 %v1038_v5  ;;  %702 = vmatpush.msrb.mxu3 %v1027_v2  ;;  %v482_v52 = vld [vmem:[#allocation2 + $0x4] ss:$8 sm:$0x3] }
 0x328   :  { %683 = vmatpush.msrb.mxu2 %v1056_v9  ;;  %703 = vmatpush.msrb.mxu3 %v1045_v6 }
 0x32a   :  { %684 = vmatpush.msrb.mxu2 %v1074_v13  ;;  %704 = vmatpush.msrb.mxu3 %v1061_v10 }
 0x32c   :  { %685 = vmatpush.msrb.mxu2 %v1084_v15  ;;  %705 = vmatpush.msrb.mxu3 %v1079_v14 }
 0x32e   :  { %686 = vmatpush.msrb.mxu2 %v1102_v19  ;;  %706 = vmatpush.msrb.mxu3 %v1097_v18 }
 0x330   :  { %687 = vmatpush.msrb.mxu2 %v1120_v23  ;;  %707 = vmatpush.msrb.mxu3 %v1115_v22 }
 0x332   :  { %688 = vmatpush.msrb.mxu2 %v1138_v27  ;;  %708 = vmatpush.msrb.mxu3 %v1133_v26 }
 0x334   :  { %689 = vmatpush.msrb.mxu2 %v1161_v32  ;;  %709 = vmatpush.msrb.mxu3 %v1156_v31 }
 0x3a8   :  { %v335_v53 = vpop.f32.mrf.mxu3  ;;  %v315_v55 = vpop.f32.mrf.mxu2 }
 0x3a9   :  { %v340_v54 = vrot.slane %v335_v53, 7 }
 0x3ab   :  { %v341_v57 = vsel %vm150_vm1, %v315_v55, %v340_v54 }
 0x3ac   :  { %v343_v58 = vadd.f32 %v341_v57, %v294_v56 }
 0x3ae   :  { %v881_v59 = vmul.f32 -1.442695, %v343_v58 }
 0x3b0   :  { %916 = vpow2.f32 %v881_v59 }
 0x3b6   :  { %v917_v60 = vpop.eup %916 }
 0x3b7   :  { %v347_v61 = vadd.f32 1.0, %v917_v60 }
 0x3b9   :  { %918 = vrcp.f32 %v347_v61  ;;  %v359_v1 = vand.u32 2147483648, %v347_v61  ;;  %v357_v4 = vand.u32 2147483647, %v347_v61  ;;  %vm353_vm13 = vweird.f32 %v347_v61 }
 0x3ba   :  { %920 = vtanh.f32 %v343_v58 }
 0x3bb   :  { %v360_v11 = vor.u32 1.1754944e-38, %v359_v1  ;;  %vm358_vm15 = vcmp.eq.f32.partialorder %v357_v4, 8.507059e+37 }
 0x3bf   :  { %v919_v62 = vpop.eup %918 }
 0x3c0   :  { %v349_v63 = vmul.f32 %v919_v62, %v347_v61  ;;  %vm354_vm12 = vweird.f32 %v919_v62  ;;  %v921_v7 = vpop.eup %920 }
 0x3c1   :  { %vm355_vm14 = vmor %vm353_vm13, %vm354_vm12  ;;  %v366_v16 = vrot.slane %v921_v7, 1 }
 0x3c2   :  { %v350_v0 = vsub.f32 1.0, %v349_v63 }
 0x3c4   :  { %v351_v3 = vmul.f32 %v919_v62, %v350_v0 }
 0x3c6   :  { %v352_v8 = vadd.f32 %v919_v62, %v351_v3 }
 0x3c8   :  { %v356_v12 = vsel %vm355_vm14, %v919_v62, %v352_v8 }
 0x3c9   :  { %v361_v17 = vsel %vm358_vm15, %v360_v11, %v356_v12 }
 0x3ca   :  { %376 = vrot.lane.b32.xlu1 %v361_v17, %s991_s2  ;;  %v368_v20 = vmul.f32 %v366_v16, %v361_v17  ;;  %v364_v21 = vmul.f32 %v361_v17, %v279_v47 }
 0x3cc   :  { %370 = vrot.lane.b32.xlu0 %v368_v20, %s991_s2 }
 0x43c   :  { %v377_v29 = vpop.permute.xlu1 %376 }
 0x43d   :  { %v378_v30 = vrot.slane %v377_v29, 1 }
 0x43e   :  { %v371_v24 = vpop.permute.xlu0 %370 }
 0x43f   :  { %v373_v25 = vadd.f32 %v371_v24, %v364_v21 }
 0x441   :  { %922 = vtanh.f32 %v373_v25 }
 0x447   :  { %v923_v28 = vpop.eup %922 }
 0x448   :  { %381 = vrot.lane.b32.xlu2 %v923_v28, %s991_s2 }
 0x4a2   :  { %v382_v33 = vpop.permute.xlu2 %381 }
 0x4a3   :  { %v384_v34 = vmul.f32 %v382_v33, %v378_v30 }
 0x4a5   :  { %385 = vst.msk [vmem:[#allocation3 + $0x2] sm:$0x1] %vm195_vm6, %v384_v34  ;;  %882 = vmatmul.msk.f32.vlgmr.msra.gmra.mxu0 %vm41_vm0, %v384_v34  ;;  %883 = vmatmul.msk.f32.vlgmr.msra.gmra.mxu1 %vm41_vm0, %v384_v34 }
 0x4a6   :  { %386 = vst.msk [vmem:[#allocation3 + $0x5] sm:$0x1] %vm197_vm7, %v384_v34  ;;  %776 = vmatpush.msra.mxu0 %v1038_v5  ;;  %796 = vmatpush.msra.mxu1 %v1027_v2  ;;  %v576_v34 = vld [vmem:[#allocation2 + $0x5] ss:$8 sm:$0x3] }
 0x4a8   :  { %777 = vmatpush.msra.mxu0 %v1056_v9  ;;  %797 = vmatpush.msra.mxu1 %v1045_v6  ;;  %v388_v9 = vld [vmem:[#allocation2 + $0x3] ss:$8 sm:$0x3] }
 0x4aa   :  { %778 = vmatpush.msra.mxu0 %v1074_v13  ;;  %798 = vmatpush.msra.mxu1 %v1061_v10 }
 0x4ac   :  { %779 = vmatpush.msra.mxu0 %v1084_v15  ;;  %799 = vmatpush.msra.mxu1 %v1079_v14 }
 0x4ae   :  { %780 = vmatpush.msra.mxu0 %v1102_v19  ;;  %800 = vmatpush.msra.mxu1 %v1097_v18 }
 0x4b0   :  { %781 = vmatpush.msra.mxu0 %v1120_v23  ;;  %801 = vmatpush.msra.mxu1 %v1115_v22 }
 0x4b2   :  { %782 = vmatpush.msra.mxu0 %v1138_v27  ;;  %802 = vmatpush.msra.mxu1 %v1133_v26 }
 0x4b4   :  { %783 = vmatpush.msra.mxu0 %v1161_v32  ;;  %803 = vmatpush.msra.mxu1 %v1156_v31 }
 0x522   :  { %v429_v2 = vpop.f32.mrf.mxu1  ;;  %v409_v6 = vpop.f32.mrf.mxu0 }
 0x523   :  { %v434_v5 = vrot.slane %v429_v2, 7 }
 0x525   :  { %v435_v10 = vsel %vm150_vm1, %v409_v6, %v434_v5 }
 0x526   :  { %v437_v13 = vadd.f32 %v435_v10, %v388_v9 }
 0x528   :  { %v884_v14 = vmul.f32 -1.442695, %v437_v13 }
 0x52a   :  { %924 = vpow2.f32 %v884_v14 }
 0x530   :  { %v925_v15 = vpop.eup %924 }
 0x531   :  { %v441_v18 = vadd.f32 1.0, %v925_v15 }
 0x533   :  { %926 = vrcp.f32 %v441_v18  ;;  %v453_v26 = vand.u32 2147483648, %v441_v18  ;;  %v451_v31 = vand.u32 2147483647, %v441_v18  ;;  %vm447_vm3 = vweird.f32 %v441_v18 }
 0x534   :  { %928 = vtanh.f32 %v437_v13 }
 0x535   :  { %v454_v36 = vor.u32 1.1754944e-38, %v453_v26  ;;  %vm452_vm5 = vcmp.eq.f32.partialorder %v451_v31, 8.507059e+37 }
 0x539   :  { %v927_v19 = vpop.eup %926 }
 0x53a   :  { %v443_v22 = vmul.f32 %v927_v19, %v441_v18  ;;  %vm448_vm2 = vweird.f32 %v927_v19  ;;  %v929_v32 = vpop.eup %928 }
 0x53b   :  { %vm449_vm4 = vmor %vm447_vm3, %vm448_vm2  ;;  %v460_v38 = vrot.slane %v929_v32, 1 }
 0x53c   :  { %v444_v23 = vsub.f32 1.0, %v443_v22 }
 0x53e   :  { %v445_v27 = vmul.f32 %v927_v19, %v444_v23 }
 0x540   :  { %v446_v35 = vadd.f32 %v927_v19, %v445_v27 }
 0x542   :  { %v450_v37 = vsel %vm449_vm4, %v927_v19, %v446_v35 }
 0x543   :  { %v455_v39 = vsel %vm452_vm5, %v454_v36, %v450_v37 }
 0x544   :  { %470 = vrot.lane.b32.xlu1 %v455_v39, %s991_s2  ;;  %v462_v40 = vmul.f32 %v460_v38, %v455_v39  ;;  %v458_v41 = vmul.f32 %v455_v39, %v373_v25 }
 0x546   :  { %464 = vrot.lane.b32.xlu0 %v462_v40, %s991_s2 }
 0x5b6   :  { %v471_v45 = vpop.permute.xlu1 %470 }
 0x5b7   :  { %v472_v46 = vrot.slane %v471_v45, 1 }
 0x5b8   :  { %v465_v42 = vpop.permute.xlu0 %464 }
 0x5b9   :  { %v467_v43 = vadd.f32 %v465_v42, %v458_v41 }
 0x5bb   :  { %930 = vtanh.f32 %v467_v43 }
 0x5c1   :  { %v931_v44 = vpop.eup %930 }
 0x5c2   :  { %475 = vrot.lane.b32.xlu2 %v931_v44, %s991_s2 }
 0x61c   :  { %v476_v47 = vpop.permute.xlu2 %475 }
 0x61d   :  { %v478_v48 = vmul.f32 %v476_v47, %v472_v46 }
 0x61f   :  { %479 = vst.msk [vmem:[#allocation3 + $0x3] sm:$0x1] %vm195_vm6, %v478_v48  ;;  %885 = vmatmul.msk.f32.vlgmr.msra.gmra.mxu2 %vm41_vm0, %v478_v48  ;;  %886 = vmatmul.msk.f32.vlgmr.msra.gmra.mxu3 %vm41_vm0, %v478_v48 }
 0x620   :  { %480 = vst.msk [vmem:[#allocation3 + $0x4] sm:$0x1] %vm197_vm7, %v478_v48  ;;  %v670_v48 = vld [vmem:[#allocation2 + $0x6] ss:$8 sm:$0x3] }
 0x6a2   :  { %v523_v49 = vpop.f32.mrf.mxu3  ;;  %v503_v51 = vpop.f32.mrf.mxu2 }
 0x6a3   :  { %v528_v50 = vrot.slane %v523_v49, 7 }
 0x6a5   :  { %v529_v53 = vsel %vm150_vm1, %v503_v51, %v528_v50 }
 0x6a6   :  { %v531_v54 = vadd.f32 %v529_v53, %v482_v52 }
 0x6a8   :  { %v887_v55 = vmul.f32 -1.442695, %v531_v54 }
 0x6aa   :  { %932 = vpow2.f32 %v887_v55 }
 0x6b0   :  { %v933_v56 = vpop.eup %932 }
 0x6b1   :  { %v535_v57 = vadd.f32 1.0, %v933_v56 }
 0x6b3   :  { %934 = vrcp.f32 %v535_v57  ;;  %v547_v61 = vand.u32 2147483648, %v535_v57  ;;  %v545_v63 = vand.u32 2147483647, %v535_v57  ;;  %vm541_vm9 = vweird.f32 %v535_v57 }
 0x6b4   :  { %936 = vtanh.f32 %v531_v54 }
 0x6b5   :  { %v548_v3 = vor.u32 1.1754944e-38, %v547_v61  ;;  %vm546_vm11 = vcmp.eq.f32.partialorder %v545_v63, 8.507059e+37 }
 0x6b9   :  { %v935_v58 = vpop.eup %934 }
 0x6ba   :  { %v537_v59 = vmul.f32 %v935_v58, %v535_v57  ;;  %vm542_vm8 = vweird.f32 %v935_v58  ;;  %v937_v0 = vpop.eup %936 }
 0x6bb   :  { %vm543_vm10 = vmor %vm541_vm9, %vm542_vm8  ;;  %v554_v7 = vrot.slane %v937_v0, 1 }
 0x6bc   :  { %v538_v60 = vsub.f32 1.0, %v537_v59 }
 0x6be   :  { %v539_v62 = vmul.f32 %v935_v58, %v538_v60 }
 0x6c0   :  { %v540_v1 = vadd.f32 %v935_v58, %v539_v62 }
 0x6c2   :  { %v544_v4 = vsel %vm543_vm10, %v935_v58, %v540_v1 }
 0x6c3   :  { %v549_v8 = vsel %vm546_vm11, %v548_v3, %v544_v4 }
 0x6c4   :  { %564 = vrot.lane.b32.xlu1 %v549_v8, %s991_s2  ;;  %v556_v11 = vmul.f32 %v554_v7, %v549_v8  ;;  %v552_v12 = vmul.f32 %v549_v8, %v467_v43 }
 0x6c6   :  { %558 = vrot.lane.b32.xlu0 %v556_v11, %s991_s2 }
 0x736   :  { %v565_v21 = vpop.permute.xlu1 %564 }
 0x737   :  { %v566_v24 = vrot.slane %v565_v21, 1 }
 0x738   :  { %v559_v16 = vpop.permute.xlu0 %558 }
 0x739   :  { %v561_v17 = vadd.f32 %v559_v16, %v552_v12 }
 0x73b   :  { %938 = vtanh.f32 %v561_v17 }
 0x741   :  { %v939_v20 = vpop.eup %938 }
 0x742   :  { %569 = vrot.lane.b32.xlu2 %v939_v20, %s991_s2 }
 0x79c   :  { %v570_v25 = vpop.permute.xlu2 %569 }
 0x79d   :  { %v572_v28 = vmul.f32 %v570_v25, %v566_v24 }
 0x79f   :  { %573 = vst.msk [vmem:[#allocation3 + $0x4] sm:$0x1] %vm195_vm6, %v572_v28  ;;  %888 = vmatmul.msk.f32.vlgmr.msrb.gmra.mxu0 %vm41_vm0, %v572_v28  ;;  %889 = vmatmul.msk.f32.vlgmr.msrb.gmra.mxu1 %vm41_vm0, %v572_v28 }
 0x7a0   :  { %574 = vst.msk [vmem:[#allocation3 + $0x3] sm:$0x1] %vm197_vm7, %v572_v28  ;;  %v764_v28 = vld [vmem:[#allocation2 + $0x7] ss:$8 sm:$0x3] }
 0x81c   :  { %v617_v29 = vpop.f32.mrf.mxu1  ;;  %v597_v33 = vpop.f32.mrf.mxu0 }
 0x81d   :  { %v622_v30 = vrot.slane %v617_v29, 7 }
 0x81f   :  { %v623_v2 = vsel %vm150_vm1, %v597_v33, %v622_v30 }
 0x820   :  { %v625_v5 = vadd.f32 %v623_v2, %v576_v34 }
 0x822   :  { %v890_v6 = vmul.f32 -1.442695, %v625_v5 }
 0x824   :  { %940 = vpow2.f32 %v890_v6 }
 0x82a   :  { %v941_v9 = vpop.eup %940 }
 0x82b   :  { %v629_v10 = vadd.f32 1.0, %v941_v9 }
 0x82d   :  { %942 = vrcp.f32 %v629_v10  ;;  %v641_v18 = vand.u32 2147483648, %v629_v10  ;;  %v639_v22 = vand.u32 2147483647, %v629_v10  ;;  %vm635_vm13 = vweird.f32 %v629_v10 }
 0x82e   :  { %944 = vtanh.f32 %v625_v5 }
 0x82f   :  { %v642_v27 = vor.u32 1.1754944e-38, %v641_v18  ;;  %vm640_vm15 = vcmp.eq.f32.partialorder %v639_v22, 8.507059e+37 }
 0x833   :  { %v943_v13 = vpop.eup %942 }
 0x834   :  { %v631_v14 = vmul.f32 %v943_v13, %v629_v10  ;;  %vm636_vm12 = vweird.f32 %v943_v13  ;;  %v945_v23 = vpop.eup %944 }
 0x835   :  { %vm637_vm14 = vmor %vm635_vm13, %vm636_vm12  ;;  %v648_v32 = vrot.slane %v945_v23, 1 }
 0x836   :  { %v632_v15 = vsub.f32 1.0, %v631_v14 }
 0x838   :  { %v633_v19 = vmul.f32 %v943_v13, %v632_v15 }
 0x83a   :  { %v634_v26 = vadd.f32 %v943_v13, %v633_v19 }
 0x83c   :  { %v638_v31 = vsel %vm637_vm14, %v943_v13, %v634_v26 }
 0x83d   :  { %v643_v35 = vsel %vm640_vm15, %v642_v27, %v638_v31 }
 0x83e   :  { %658 = vrot.lane.b32.xlu1 %v643_v35, %s991_s2  ;;  %v650_v36 = vmul.f32 %v648_v32, %v643_v35  ;;  %v646_v37 = vmul.f32 %v643_v35, %v561_v17 }
 0x840   :  { %652 = vrot.lane.b32.xlu0 %v650_v36, %s991_s2 }
 0x8b0   :  { %v659_v41 = vpop.permute.xlu1 %658 }
 0x8b1   :  { %v660_v42 = vrot.slane %v659_v41, 1 }
 0x8b2   :  { %v653_v38 = vpop.permute.xlu0 %652 }
 0x8b3   :  { %v655_v39 = vadd.f32 %v653_v38, %v646_v37 }
 0x8b5   :  { %946 = vtanh.f32 %v655_v39 }
 0x8bb   :  { %v947_v40 = vpop.eup %946 }
 0x8bc   :  { %663 = vrot.lane.b32.xlu2 %v947_v40, %s991_s2 }
 0x916   :  { %v664_v43 = vpop.permute.xlu2 %663 }
 0x917   :  { %v666_v44 = vmul.f32 %v664_v43, %v660_v42 }
 0x919   :  { %667 = vst.msk [vmem:[#allocation3 + $0x5] sm:$0x1] %vm195_vm6, %v666_v44  ;;  %891 = vmatmul.msk.f32.vlgmr.msrb.gmra.mxu2 %vm41_vm0, %v666_v44  ;;  %892 = vmatmul.msk.f32.vlgmr.msrb.gmra.mxu3 %vm41_vm0, %v666_v44 }
 0x91a   :  { %668 = vst.msk [vmem:[#allocation3 + $0x2] sm:$0x1] %vm197_vm7, %v666_v44 }
 0x99c   :  { %v711_v45 = vpop.f32.mrf.mxu3  ;;  %v691_v47 = vpop.f32.mrf.mxu2 }
 0x99d   :  { %v716_v46 = vrot.slane %v711_v45, 7 }
 0x99f   :  { %v717_v49 = vsel %vm150_vm1, %v691_v47, %v716_v46 }
 0x9a0   :  { %v719_v50 = vadd.f32 %v717_v49, %v670_v48 }
 0x9a2   :  { %v893_v51 = vmul.f32 -1.442695, %v719_v50 }
 0x9a4   :  { %948 = vpow2.f32 %v893_v51 }
 0x9aa   :  { %v949_v52 = vpop.eup %948 }
 0x9ab   :  { %v723_v53 = vadd.f32 1.0, %v949_v52 }
 0x9ad   :  { %950 = vrcp.f32 %v723_v53  ;;  %v735_v57 = vand.u32 2147483648, %v723_v53  ;;  %v733_v59 = vand.u32 2147483647, %v723_v53  ;;  %vm729_vm3 = vweird.f32 %v723_v53 }
 0x9ae   :  { %952 = vtanh.f32 %v719_v50 }
 0x9af   :  { %v736_v62 = vor.u32 1.1754944e-38, %v735_v57  ;;  %vm734_vm5 = vcmp.eq.f32.partialorder %v733_v59, 8.507059e+37 }
 0x9b3   :  { %v951_v54 = vpop.eup %950 }
 0x9b4   :  { %v725_v55 = vmul.f32 %v951_v54, %v723_v53  ;;  %vm730_vm2 = vweird.f32 %v951_v54  ;;  %v953_v60 = vpop.eup %952 }
 0x9b5   :  { %vm731_vm4 = vmor %vm729_vm3, %vm730_vm2  ;;  %v742_v0 = vrot.slane %v953_v60, 1 }
 0x9b6   :  { %v726_v56 = vsub.f32 1.0, %v725_v55 }
 0x9b8   :  { %v727_v58 = vmul.f32 %v951_v54, %v726_v56 }
 0x9ba   :  { %v728_v61 = vadd.f32 %v951_v54, %v727_v58 }
 0x9bc   :  { %v732_v63 = vsel %vm731_vm4, %v951_v54, %v728_v61 }
 0x9bd   :  { %v737_v1 = vsel %vm734_vm5, %v736_v62, %v732_v63 }
 0x9be   :  { %752 = vrot.lane.b32.xlu1 %v737_v1, %s991_s2  ;;  %v744_v3 = vmul.f32 %v742_v0, %v737_v1  ;;  %v740_v4 = vmul.f32 %v737_v1, %v655_v39 }
 0x9c0   :  { %746 = vrot.lane.b32.xlu0 %v744_v3, %s991_s2 }
 0xa30   :  { %v753_v12 = vpop.permute.xlu1 %752 }
 0xa31   :  { %v754_v16 = vrot.slane %v753_v12, 1 }
 0xa32   :  { %v747_v7 = vpop.permute.xlu0 %746 }
 0xa33   :  { %v749_v8 = vadd.f32 %v747_v7, %v740_v4 }
 0xa35   :  { %954 = vtanh.f32 %v749_v8 }
 0xa3b   :  { %v955_v11 = vpop.eup %954 }
 0xa3c   :  { %757 = vrot.lane.b32.xlu2 %v955_v11, %s991_s2 }
 0xa96   :  { %v758_v17 = vpop.permute.xlu2 %757 }
 0xa97   :  { %v760_v20 = vmul.f32 %v758_v17, %v754_v16 }
 0xa99   :  { %761 = vst.msk [vmem:[#allocation3 + $0x6] sm:$0x1] %vm195_vm6, %v760_v20  ;;  %894 = vmatmul.msk.f32.vlgmr.msra.gmra.mxu0 %vm41_vm0, %v760_v20  ;;  %895 = vmatmul.msk.f32.vlgmr.msra.gmra.mxu1 %vm41_vm0, %v760_v20 }
 0xa9a   :  { %762 = vst.msk [vmem:[#allocation3 + $0x1] sm:$0x1] %vm197_vm7, %v760_v20 }
 0xb16   :  { %v805_v21 = vpop.f32.mrf.mxu1  ;;  %v785_v25 = vpop.f32.mrf.mxu0 }
 0xb17   :  { %v810_v24 = vrot.slane %v805_v21, 7 }
 0xb19   :  { %v811_v29 = vsel %vm150_vm1, %v785_v25, %v810_v24 }
 0xb1a   :  { %v813_v30 = vadd.f32 %v811_v29, %v764_v28 }
 0xb1c   :  { %v896_v33 = vmul.f32 -1.442695, %v813_v30 }
 0xb1e   :  { %956 = vpow2.f32 %v896_v33 }
 0xb24   :  { %v957_v34 = vpop.eup %956 }
 0xb25   :  { %v817_v2 = vadd.f32 1.0, %v957_v34 }
 0xb27   :  { %958 = vrcp.f32 %v817_v2  ;;  %v829_v10 = vand.u32 2147483648, %v817_v2  ;;  %v827_v14 = vand.u32 2147483647, %v817_v2  ;;  %vm823_vm8 = vweird.f32 %v817_v2 }
 0xb28   :  { %960 = vtanh.f32 %v813_v30 }
 0xb29   :  { %v830_v19 = vor.u32 1.1754944e-38, %v829_v10  ;;  %vm828_vm1 = vcmp.eq.f32.partialorder %v827_v14, 8.507059e+37 }
 0xb2d   :  { %v959_v5 = vpop.eup %958 }
 0xb2e   :  { %v819_v6 = vmul.f32 %v959_v5, %v817_v2  ;;  %vm824_vm0 = vweird.f32 %v959_v5  ;;  %v961_v15 = vpop.eup %960 }
 0xb2f   :  { %vm825_vm9 = vmor %vm823_vm8, %vm824_vm0  ;;  %v836_v23 = vrot.slane %v961_v15, 1 }
 0xb30   :  { %v820_v9 = vsub.f32 1.0, %v819_v6 }
 0xb32   :  { %v821_v13 = vmul.f32 %v959_v5, %v820_v9 }
 0xb34   :  { %v822_v18 = vadd.f32 %v959_v5, %v821_v13 }
 0xb36   :  { %v826_v22 = vsel %vm825_vm9, %v959_v5, %v822_v18 }
 0xb37   :  { %v831_v26 = vsel %vm828_vm1, %v830_v19, %v826_v22 }
 0xb38   :  { %846 = vrot.lane.b32.xlu1 %v831_v26, %s991_s2  ;;  %v838_v27 = vmul.f32 %v836_v23, %v831_v26  ;;  %v834_v31 = vmul.f32 %v831_v26, %v749_v8 }
 0xb3a   :  { %840 = vrot.lane.b32.xlu0 %v838_v27, %s991_s2 }
 0xbaa   :  { %v847_v37 = vpop.permute.xlu1 %846 }
 0xbab   :  { %v848_v38 = vrot.slane %v847_v37, 1 }
 0xbac   :  { %v841_v32 = vpop.permute.xlu0 %840 }
 0xbad   :  { %v843_v35 = vadd.f32 %v841_v32, %v834_v31 }
 0xbaf   :  { %962 = vtanh.f32 %v843_v35 }
 0xbb5   :  { %v963_v36 = vpop.eup %962 }
 0xbb6   :  { %851 = vrot.lane.b32.xlu2 %v963_v36, %s991_s2 }
 0xc10   :  { %v852_v39 = vpop.permute.xlu2 %851 }
 0xc11   :  { %v854_v40 = vmul.f32 %v852_v39, %v848_v38 }
 0xc13   :  { %855 = vst.msk [vmem:[#allocation3 + $0x7] sm:$0x1] %vm195_vm6, %v854_v40 }
 0xc14   :  { %856 = vst.msk [vmem:[#allocation3] sm:$0x1] %vm197_vm7, %v854_v40 }
 0xc15   :  { %867 = dma.vmem_to_hbm [thread:$0]  %s863_s29, 128, %s865_s6, [#allocation4]  }
 0xc16   :  { %988 = dma.done.wait [#allocation4], 128  }
 0xc17   :  { %989 = vsyncadd [#allocation4], 4294967168 }
 0xc18   :  { %872 = vsyncpa [#allocation4], 1 }

</bundles_post_ra>
